<compile_context>
chip_gen: v7x
topology: tpu7x:2x2x1
jax: 0.10.0
libtpu: 0.0.40
codegen_flags: <defaults>
</compile_context>

<pallas_src>
import functools

import jax
import jax.numpy as jnp
from jax.experimental import pallas as pl
from jax.experimental.pallas import tpu as pltpu


def _round_up(x, n):
    return ((x + n - 1) // n) * n


def _cdiv(a, b):
    return -(-a // b)


def _make_kernel(m, k_pad, project):
    """Builds the Pallas kernel body for static (m, k_pad, project)."""

    def kernel(*refs):
        if project:
            idx_ref, fbd_ref, flast_ref, res_ref = refs
        else:
            idx_ref, fbd_ref, res_ref = refs
            flast_ref = None

        sum_dims = fbd_ref.shape[1]
        tile_b = idx_ref.shape[1]

        # Concatenated one-hot over all indexed modes. Modes occupy disjoint
        # row ranges (indices were offset in the wrapper), so a boolean OR of
        # per-mode compares is an exact concatenated one-hot. One iota, no
        # zeros init, single cast at the end.
        iota = jax.lax.broadcasted_iota(jnp.int32, (sum_dims, tile_b), 0)
        mask = iota == idx_ref[0:1, :]
        for i in range(1, m):
            mask = mask | (iota == idx_ref[i:i + 1, :])
        oh = mask.astype(jnp.float32)

        # One fused gather matmul: (m*k_pad, sum_dims) @ (sum_dims, TILE_B).
        gathered = jnp.dot(fbd_ref[...], oh,
                           preferred_element_type=jnp.float32)

        # Elementwise product over modes on the VPU: (k_pad, TILE_B).
        # k_pad is a multiple of 8, so every slice is sublane-aligned.
        prod = gathered[0:k_pad, :]
        for i in range(1, m):
            prod = prod * gathered[i * k_pad:(i + 1) * k_pad, :]

        if project:
            # (dim_last, k_pad) @ (k_pad, TILE_B) -> lane-dense output.
            res_ref[...] = jnp.dot(flast_ref[...], prod,
                                   preferred_element_type=jnp.float32)
        else:
            res_ref[...] = jnp.sum(prod, axis=0, keepdims=True)

    return kernel


@functools.partial(jax.jit, static_argnames=("tile_b", "lane_major_output"))
def policy_parafac_forward(indices, factors, log_sigma, max_sigma, *,
                           tile_b=2048, lane_major_output=False):
    """JAX wrapper for the PolicyPARAFAC forward pass (model='gaussian')."""
    bsz, m = indices.shape
    n_factors = len(factors)
    k = int(factors[0].shape[1])
    k_pad = _round_up(k, 8)              # keep per-mode blocks sublane-aligned
    project = m < n_factors

    gathered_dims = [int(factors[i].shape[0]) for i in range(m)]
    sum_dims = sum(gathered_dims)
    offsets = [0]
    for d in gathered_dims[:-1]:
        offsets.append(offsets[-1] + d)

    # Block-diagonal matrix of transposed gathered factors: (m*k_pad, sum_dims).
    # Rows k..k_pad-1 of every mode block are zero -> padded prod rows are zero.
    f_bd = jnp.zeros((m * k_pad, sum_dims), jnp.float32)
    for i in range(m):
        f_bd = f_bd.at[i * k_pad:i * k_pad + k,
                       offsets[i]:offsets[i] + gathered_dims[i]].set(
                           factors[i].astype(jnp.float32).T)

    if project:
        dim_last = int(factors[-1].shape[0])
        flast = jnp.zeros((dim_last, k_pad), jnp.float32).at[:, :k].set(
            factors[-1].astype(jnp.float32))
        out_rows = dim_last
    else:
        out_rows = 1

    # ---------------- tile selection (all Python ints, trace-time) ----------
    def _vmem_bytes(t):
        # Coarse per-step VMEM footprint: double-buffered streamed blocks,
        # resident factor blocks, and the in-kernel intermediates.
        sub = lambda r: _round_up(max(r, 1), 8)
        streamed = 2 * 4 * t * (sub(m) + sub(out_rows))
        resident = 2 * 4 * (m * k_pad * max(sum_dims, 128)
                            + (out_rows * max(k_pad, 128) if project else 0))
        interm = 4 * t * (3 * sub(sum_dims) + m * k_pad + k_pad)
        return streamed + resident + interm

    bsz_128 = _round_up(max(bsz, 1), 128)
    cap = min(_round_up(max(int(tile_b), 128), 128), bsz_128)
    if bsz_128 >= 256:
        # Guarantee >=2 grid steps so v7x's two TensorCores both get work
        # (the extra ~0.35 us step is negligible on single-TC v5e/v6e).
        cap = min(cap, _round_up(_cdiv(bsz_128, 2), 128))
    VMEM_BUDGET = 24 * 1024 * 1024       # conservative vs v7x 32 MiB scoped
    while cap > 128 and _vmem_bytes(cap) > VMEM_BUDGET:
        cap -= 128
    # Minimize grid steps first (amortize step overhead), then pick the
    # smallest 128-multiple tile achieving that step count (min padding).
    steps = _cdiv(bsz_128, cap)
    tile = _round_up(_cdiv(bsz_128, steps), 128)
    bsz_p = tile * steps

    # Indices: add per-mode row offsets, transpose to (m, bsz), pad the batch.
    # Padded columns are 0, which selects mode-0 row 0 only; other mode blocks
    # gather zeros there, so padded results are 0 and get sliced away below.
    idx = indices.astype(jnp.int32) + jnp.asarray(offsets, jnp.int32)[None, :]
    idx = jnp.pad(idx.T, ((0, 0), (0, bsz_p - bsz)))        # (m, bsz_p)

    kernel = _make_kernel(m, k_pad, project)

    in_specs = [
        pl.BlockSpec((m, tile), lambda b: (0, b)),           # streamed indices
        pl.BlockSpec((m * k_pad, sum_dims), lambda b: (0, 0)),  # resident f_bd
    ]
    operands = [idx, f_bd]
    if project:
        in_specs.append(pl.BlockSpec((out_rows, k_pad), lambda b: (0, 0)))
        operands.append(flast)

    flops = 2 * m * k_pad * sum_dims * bsz_p + (m - 1) * k_pad * bsz_p
    flops += (2 * out_rows * k_pad * bsz_p) if project else (k_pad * bsz_p)
    bytes_accessed = 4 * (m * bsz_p + m * k_pad * sum_dims
                          + (out_rows * k_pad if project else 0)
                          + out_rows * bsz_p)

    res_t = pl.pallas_call(
        kernel,
        out_shape=jax.ShapeDtypeStruct((out_rows, bsz_p), jnp.float32),
        grid=(steps,),
        in_specs=in_specs,
        out_specs=pl.BlockSpec((out_rows, tile), lambda b: (0, b)),
        compiler_params=pltpu.CompilerParams(
            dimension_semantics=("parallel",),
            vmem_limit_bytes=32 * 1024 * 1024),
        cost_estimate=pl.CostEstimate(
            flops=int(flops), transcendentals=0,
            bytes_accessed=int(bytes_accessed)),
    )(*operands)

    # Sigma clamp is grid-independent -> plain XLA op in the wrapper.
    sigma = jnp.clip(log_sigma.astype(jnp.float32), -2.5, max_sigma)

    if lane_major_output:
        # Skip the extra HBM transpose pass; result layout is (dim_last, bsz)
        # (or (bsz,) for the no-projection case).
        res = res_t[:, :bsz] if project else res_t[0, :bsz]
        return res, sigma

    if project:
        res = res_t.T[:bsz, :]            # module contract: (bsz, dim_last)
    else:
        res = res_t[0, :bsz]              # (bsz,)
    return res, sigma


def _reference_forward(indices, factors, log_sigma, max_sigma):
    """Pure-JAX reference mirroring the PyTorch semantics (f32)."""
    bsz, m = indices.shape
    k = factors[0].shape[1]
    prod = jnp.ones((bsz, k), jnp.float32)
    for i in range(m):
        prod = prod * factors[i][indices[:, i], :]
    if m < len(factors):
        res = jnp.dot(prod, factors[-1].T, precision=jax.lax.Precision.HIGHEST)
    else:
        res = jnp.sum(prod, axis=-1)
    return res, jnp.clip(log_sigma, -2.5, max_sigma)


if __name__ == "__main__":
    # Module config (small): dims=(6, 7, 5), k=6 (exercises k->k_pad padding),
    # num_outputs=5, gaussian model.
    dims = (6, 7, 5)
    k = 6
    num_outputs = dims[-1]
    scale, bias, max_sigma = 1.0, 0.0, 0.0

    key = jax.random.PRNGKey(0)
    fkeys = jax.random.split(key, len(dims))
    factors = [
        scale * (jax.random.normal(fkeys[i], (dims[i], k), jnp.float32) + bias)
        for i in range(len(dims))
    ]
    log_sigma = jnp.zeros((1, num_outputs), jnp.float32) + max_sigma

    def make_indices(seed, bsz, m):
        cols = []
        for i in range(m):
            ki = jax.random.fold_in(jax.random.PRNGKey(seed), i)
            cols.append(jax.random.randint(ki, (bsz,), 0, dims[i], jnp.int32))
        return jnp.stack(cols, axis=1)

    # Case 1: index first 2 of 3 modes -> res = prod @ factors[-1].T, (bsz, 5).
    idx1 = make_indices(1, 4, 2)
    res1, sig1 = policy_parafac_forward(idx1, factors, log_sigma, max_sigma)
    jax.block_until_ready(res1)
    jax.block_until_ready(sig1)
    ref1, sref1 = _reference_forward(idx1, factors, log_sigma, max_sigma)
    assert jnp.allclose(res1, ref1, atol=1e-4, rtol=1e-5), "case1 result mismatch"
    assert jnp.allclose(sig1, sref1), "case1 sigma mismatch"

    # Case 2: index all 3 modes, bsz=300 -> 2-step grid + padded batch columns.
    idx2 = make_indices(2, 300, 3)
    res2, sig2 = policy_parafac_forward(idx2, factors, log_sigma, max_sigma)
    jax.block_until_ready(res2)
    ref2, sref2 = _reference_forward(idx2, factors, log_sigma, max_sigma)
    assert jnp.allclose(res2, ref2, atol=1e-4, rtol=1e-5), "case2 result mismatch"
    assert jnp.allclose(sig2, sref2), "case2 sigma mismatch"

    # Case 3: lane-major output path (no wrapper transpose), projection case.
    res3, _ = policy_parafac_forward(idx1, factors, log_sigma, max_sigma,
                                     lane_major_output=True)
    jax.block_until_ready(res3)
    assert jnp.allclose(res3, ref1.T, atol=1e-4, rtol=1e-5), "case3 result mismatch"

    print("KERNEL_OK")
</pallas_src>

<mosaic_0001>
module attributes {stable_mosaic.version = 11 : i64} {
  func.func @kernel(%arg0: i32, %arg1: memref<2x128xi32, #tpu.memory_space<vmem>>, %arg2: memref<16x13xf32, #tpu.memory_space<vmem>>, %arg3: memref<5x8xf32, #tpu.memory_space<vmem>>, %arg4: memref<5x128xf32, #tpu.memory_space<vmem>>) attributes {dimension_semantics = [#tpu.dimension_semantics<parallel>], iteration_bounds = array<i64: 1>, scalar_prefetch = 0 : i64, scratch_operands = 0 : i64, tpu.core_type = #tpu.core_type<tc>, window_params = [{transform_indices = @transform_0, window_bounds = array<i64: 2, 128>}, {pipeline_mode = #tpu.pipeline_mode<synchronous>, transform_indices = @transform_1, window_bounds = array<i64: 16, 13>}, {pipeline_mode = #tpu.pipeline_mode<synchronous>, transform_indices = @transform_2, window_bounds = array<i64: 5, 8>}, {transform_indices = @transform_3, window_bounds = array<i64: 5, 128>}]} {
    %0 = tpu.iota {dimensions = array<i32: 0>} : vector<13x128xi32>
    %c0 = arith.constant 0 : index
    %c0_0 = arith.constant 0 : index
    %1 = vector.load %arg1[%c0, %c0_0] : memref<2x128xi32, #tpu.memory_space<vmem>>, vector<1x128xi32>
    %2 = vector.broadcast %1 : vector<1x128xi32> to vector<13x128xi32>
    %3 = arith.cmpi eq, %0, %2 : vector<13x128xi32>
    %c1 = arith.constant 1 : index
    %c0_1 = arith.constant 0 : index
    %4 = vector.load %arg1[%c1, %c0_1] : memref<2x128xi32, #tpu.memory_space<vmem>>, vector<1x128xi32>
    %5 = vector.broadcast %4 : vector<1x128xi32> to vector<13x128xi32>
    %6 = arith.cmpi eq, %0, %5 : vector<13x128xi32>
    %7 = arith.ori %3, %6 : vector<13x128xi1>
    %8 = arith.extui %7 : vector<13x128xi1> to vector<13x128xi32>
    %9 = arith.sitofp %8 : vector<13x128xi32> to vector<13x128xf32>
    %c0_2 = arith.constant 0 : index
    %c0_3 = arith.constant 0 : index
    %10 = vector.load %arg2[%c0_2, %c0_3] : memref<16x13xf32, #tpu.memory_space<vmem>>, vector<16x13xf32>
    %cst = arith.constant dense<0.000000e+00> : vector<16x128xf32>
    %11 = tpu.matmul %10, %9, %cst {dimension_numbers = #tpu.dot_dimension_numbers<[1], [0], [0], [1], [0, 0, 1, 1], [], []>} : vector<16x13xf32>, vector<13x128xf32>, vector<16x128xf32> -> vector<16x128xf32>
    %12 = vector.extract_strided_slice %11 {offsets = [0, 0], sizes = [8, 128], strides = [1, 1]} : vector<16x128xf32> to vector<8x128xf32>
    %13 = vector.extract_strided_slice %11 {offsets = [8, 0], sizes = [8, 128], strides = [1, 1]} : vector<16x128xf32> to vector<8x128xf32>
    %14 = arith.mulf %12, %13 : vector<8x128xf32>
    %c0_4 = arith.constant 0 : index
    %c0_5 = arith.constant 0 : index
    %15 = vector.load %arg3[%c0_4, %c0_5] : memref<5x8xf32, #tpu.memory_space<vmem>>, vector<5x8xf32>
    %cst_6 = arith.constant dense<0.000000e+00> : vector<5x128xf32>
    %16 = tpu.matmul %15, %14, %cst_6 {dimension_numbers = #tpu.dot_dimension_numbers<[1], [0], [0], [1], [0, 0, 1, 1], [], []>} : vector<5x8xf32>, vector<8x128xf32>, vector<5x128xf32> -> vector<5x128xf32>
    %c0_7 = arith.constant 0 : index
    %c0_8 = arith.constant 0 : index
    %17 = vector.load %arg4[%c0_7, %c0_8] : memref<5x128xf32, #tpu.memory_space<vmem>>, vector<5x128xf32>
    tpu.vector_store %arg4[%c0_7, %c0_8], %16 {strides = array<i32>} : memref<5x128xf32, #tpu.memory_space<vmem>>, vector<5x128xf32>,
    return
  }
  func.func @transform_0(%arg0: i32) -> (i32, i32) {
    %c0_i32 = arith.constant 0 : i32
    %c0_i32_0 = arith.constant 0 : i32
    return %c0_i32, %arg0 : i32, i32
  }
  func.func @transform_1(%arg0: i32) -> (i32, i32) {
    %c0_i32 = arith.constant 0 : i32
    %c0_i32_0 = arith.constant 0 : i32
    %c0_i32_1 = arith.constant 0 : i32
    return %c0_i32, %c0_i32_0 : i32, i32
  }
  func.func @transform_2(%arg0: i32) -> (i32, i32) {
    %c0_i32 = arith.constant 0 : i32
    %c0_i32_0 = arith.constant 0 : i32
    %c0_i32_1 = arith.constant 0 : i32
    return %c0_i32, %c0_i32_0 : i32, i32
  }
  func.func @transform_3(%arg0: i32) -> (i32, i32) {
    %c0_i32 = arith.constant 0 : i32
    %c0_i32_0 = arith.constant 0 : i32
    return %c0_i32, %arg0 : i32, i32
  }
}

</mosaic_0001>

<bundles_post_ra>
// kernel: policy_parafac_forward.1
= control target key start
LH: loop header
LB: loop body
LE: loop exit
PB: predicated region body
PF: predicated region fallthrough
CT: control target
= control target key end

     0   :  { %v14_v0 = vlaneseq  ;;  %vm39_vm0 = vcmask 105472   ;;  %v242_v2 = vmov 0.0   ;;  %vm46_vm4 = vcmask 1044480   ;;  %s285_s0 = inlined_call_operand.vmem [shape: s32[2,128], index: 0, kind: input, shape index: {}]   ;;  %s286_s1 = inlined_call_operand.vmem [shape: f32[16,13], index: 1, kind: input, shape index: {}]   ;;  %s287_s2 = inlined_call_operand.vmem [shape: f32[5,8], index: 2, kind: input, shape index: {}]   ;;  %s288_s3 = inlined_call_operand.vmem [shape: f32[5,128], index: 3, kind: output, shape index: {}]  }
   0x1   :  { %v37_v1 = vld [vmem:[%s286_s1] sm:$0xff]  ;;  %228 = vmatprep.subr.mxu1 %v242_v2  ;;  %v243_v8 = vmov 1.0   ;;  %v38_v10 = vld [vmem:[%s286_s1 + $0x8] sm:$0xff]  ;;  %vm244_vm9 = vmmov 0   ;;  %vm127_vm10 = vcmask 64512  }
   0x2   :  { %v15_v3 = vshrl.u32 %v14_v0, 7  ;;  %225 = vmatprep.mubr.msk.f32.mxu0 %vm39_vm0, %v37_v1  ;;  %v206_v4 = vld [vmem:[%s285_s0] ss:$0 sm:$0xff]  ;;  %v207_v5 = vld [vmem:[%s285_s0 + $0x1] ss:$0 sm:$0xff]  ;;  %230 = vmatprep.mubr.msk.f32.mxu1 %vm244_vm9, %v242_v2 }
   0x3   :  { %v126_v14 = vld [vmem:[%s287_s2] sm:$0x1f] }
   0x4   :  { %v16_v6 = vadd.s32 8, %v15_v3  ;;  %vm22_vm1 = vcmp.eq.s32.totalorder %v15_v3, %v206_v4  ;;  %vm29_vm2 = vcmp.eq.s32.totalorder %v15_v3, %v207_v5 }
   0x5   :  { %vm31_vm3 = vmor %vm22_vm1, %vm29_vm2 }
   0x6   :  { %vm23_vm5 = vcmp.eq.s32.totalorder %v16_v6, %v206_v4  ;;  %vm30_vm6 = vcmp.eq.s32.totalorder %v16_v6, %v207_v5  ;;  %vm234_vm8 = vmpackc.low %vm46_vm4, %vm31_vm3 }
   0x7   :  { %vm32_vm7 = vmor %vm23_vm5, %vm30_vm6 }
   0x8   :  { %v209_v7 = vsel %vm32_vm7, 1.0, %v242_v2 }
   0x9   :  { %v233_v9 = vpack.c.bf16 %v209_v7, %v243_v8 }
   0xb   :  { %235 = vmatprep.subr.msk.bf16.mxu0 %vm234_vm8, %v233_v9 }
   0xc   :  { %238 = vmatpush3.bf16.msk.msra.mxu0 %vm234_vm8, %v233_v9 }
   0xf   :  { %226 = vmatmul.mubr.msk.f32.vlgmr.msra.gmra.mrb[0].mxu0 %vm39_vm0, %v38_v10 }
  0xe2   :  { %v227_v11 = vpop.f32.mrb[0].mxu0 }
  0xe3   :  { %v116_v12 = vpop.f32.mrb[1].mxu0 }
  0xe4   :  { %v125_v13 = vmul.f32 %v227_v11, %v116_v12 }
  0xe6   :  { %229 = vmatpush3.msra.mxu1 %v125_v13 }
  0xe7   :  { %231 = vmatmul.mubr.msk.f32.vlgmr.msra.gmra.mrb[0].mxu1 %vm127_vm10, %v126_v14 }
 0x1ba   :  { %v197_v15 = vpop.f32.mrb[0].mxu1 }
 0x1bb   :  { %201 = vst [vmem:[%s288_s3] sm:$0x1f] %v197_v15  ;;  %v232_v16 = vpop.f32.mrb[1].mxu1 }

</bundles_post_ra>
